<compile_context>
chip_gen: v7x
topology: tpu7x:2x2x1
jax: 0.10.0
libtpu: 0.0.40
codegen_flags: <defaults>
</compile_context>

<pallas_src>
import jax
import jax.numpy as jnp
from jax import lax
from jax.experimental import pallas as pl
from jax.experimental.pallas import tpu as pltpu
import numpy as np

_TINY = float(np.finfo(np.float32).tiny)


def mingru_kernel(x_ref, h0_ref, w_ref, b_ref, out_ref,
                  tri_ref, carry_a_ref, carry_run_ref):
    # x_ref: (Ct, D)        h0_ref: (1, Hb)
    # w_ref: (D, 2*Hb)      b_ref: (1, 2*Hb)     out_ref: (Ct, Hb)
    # tri_ref: (Ct, Ct) scratch   carry_*: (1, Hb) scratch (persist across t)
    t = pl.program_id(2)
    hb = out_ref.shape[-1]

    @pl.when(t == 0)
    def _():
        # Lower-triangular prefix-sum operator, rebuilt per (h, b) slice
        # (cheap VALU work; correct under megacore sharding of the parallel axes).
        rows = lax.broadcasted_iota(jnp.int32, tri_ref.shape, 0)
        cols = lax.broadcasted_iota(jnp.int32, tri_ref.shape, 1)
        tri_ref[...] = (rows >= cols).astype(jnp.float32)
        carry_a_ref[...] = jnp.zeros_like(carry_a_ref)
        h0 = h0_ref[...].astype(jnp.float32)
        g0 = jnp.where(h0 >= 0, h0 + 0.5, jax.nn.sigmoid(h0))
        carry_run_ref[...] = jnp.log(jnp.maximum(g0, _TINY))   # log_g(h0)

    # Fused gate projection on the MXU with f32 accumulation.
    proj = jnp.dot(x_ref[...], w_ref[...],
                   preferred_element_type=jnp.float32) + b_ref[...]
    k = proj[:, :hb]        # lane-aligned slices (hb % 128 == 0) -> free
    hlin = proj[:, hb:]

    # One softplus(k) feeds both log_coeffs and log_z (softplus identity).
    sp_k = jnp.logaddexp(k, 0.0)        # softplus(k), numerically stable
    log_coeffs = -sp_k
    log_z = k - sp_k                    # == -softplus(-k)
    g_h = jnp.where(hlin >= 0, hlin + 0.5, jax.nn.sigmoid(hlin))
    log_tilde_h = jnp.log(jnp.maximum(g_h, _TINY))              # log_g(hlin)
    v = log_z + log_tilde_h

    tri = tri_ref[...]
    # Within-chunk inclusive prefix sum of log_coeffs on the MXU + carry.
    a_star = carry_a_ref[...] + jnp.dot(tri, log_coeffs,
                                        preferred_element_type=jnp.float32)

    # Blocked logcumsumexp: h_t = exp(a*_t) * sum_{s<=t} exp(v_s - a*_s)
    w = v - a_star
    run = carry_run_ref[...]                                    # running logsumexp
    m = jnp.maximum(run, jnp.max(w, axis=0, keepdims=True))
    e = jnp.exp(w - m)
    prefix = jnp.dot(tri, e, preferred_element_type=jnp.float32)
    total = jnp.exp(run - m) + prefix
    q = jnp.exp(a_star + m)
    out_ref[...] = (q * total).astype(out_ref.dtype)

    # Carries from the last row of this chunk.
    carry_a_ref[...] = a_star[-1:, :]
    carry_run_ref[...] = m + jnp.log(total[-1:, :])


def _round_up(n, m):
    return ((n + m - 1) // m) * m


def _default_time_chunk():
    # v5e MXU tiles are 128x128 -> ct=256 buys nothing there; v6e/v7x have a
    # 256-wide MXU and plenty of MXU slack (kernel is EUP-bound).
    try:
        kind = jax.devices()[0].device_kind.lower()
    except Exception:
        kind = ""
    return 128 if "v5" in kind else 256


def mingru_forward(x, h0, wz_t, bz, wh_t, bh, *, time_chunk=None, h_block=None,
                   proj_dtype=jnp.float32, out_dtype=None):
    """x: (B,T,D); h0: (B,H); wz_t/wh_t: (D,H) (pre-transposed); bz/bh: (H,)."""
    B, T, D = x.shape
    H = wz_t.shape[1]
    out_dtype = out_dtype or jnp.float32

    # Lane-dense hidden blocking: pad H to a multiple of 128.
    H_pad = _round_up(H, 128)
    hb = h_block if (h_block is not None and H_pad % h_block == 0) else 128

    # Time chunking: bounded chunk + pad (never ct=T -> no O(T^2) tri blowup).
    if time_chunk is None:
        time_chunk = _default_time_chunk()
    ct = _round_up(min(time_chunk, _round_up(T, 8)), 8)
    T_pad = _round_up(T, ct)

    if T_pad != T:
        x = jnp.pad(x, ((0, 0), (0, T_pad - T), (0, 0)))
    if H_pad != H:
        wz_t = jnp.pad(wz_t, ((0, 0), (0, H_pad - H)))
        wh_t = jnp.pad(wh_t, ((0, 0), (0, H_pad - H)))
        bz = jnp.pad(bz, ((0, H_pad - H),))
        bh = jnp.pad(bh, ((0, H_pad - H),))
        h0 = jnp.pad(h0, ((0, 0), (0, H_pad - H)))

    # Fuse the two projections with a block-interleaved layout so each hidden
    # block h sees contiguous [Wz_h | Wh_h] columns.
    nhb = H_pad // hb
    w_fused = jnp.concatenate(
        [wz_t.reshape(D, nhb, hb), wh_t.reshape(D, nhb, hb)], axis=2
    ).reshape(D, 2 * H_pad).astype(proj_dtype)
    b_fused = jnp.concatenate(
        [bz.reshape(1, nhb, hb), bh.reshape(1, nhb, hb)], axis=2
    ).reshape(1, 2 * H_pad).astype(jnp.float32)

    x_in = x.astype(proj_dtype)
    h0_r = h0.reshape(B, 1, H_pad).astype(jnp.float32)

    grid = (H_pad // hb, B, T_pad // ct)   # weights re-DMA'd only per h block

    out = pl.pallas_call(
        mingru_kernel,
        out_shape=jax.ShapeDtypeStruct((B, T_pad, H_pad), out_dtype),
        grid_spec=pltpu.PrefetchScalarGridSpec(
            num_scalar_prefetch=0,
            grid=grid,
            in_specs=[
                pl.BlockSpec((None, ct, D), lambda h, b, t: (b, t, 0)),     # x chunk
                pl.BlockSpec((None, 1, hb), lambda h, b, t: (b, 0, h)),     # h0
                pl.BlockSpec((D, 2 * hb), lambda h, b, t: (0, h)),          # [Wz|Wh]
                pl.BlockSpec((1, 2 * hb), lambda h, b, t: (0, h)),          # [bz|bh]
            ],
            out_specs=pl.BlockSpec((None, ct, hb), lambda h, b, t: (b, t, h)),
            scratch_shapes=[
                pltpu.VMEM((ct, ct), jnp.float32),   # lower-triangular operator
                pltpu.VMEM((1, hb), jnp.float32),    # cumsum(log_coeffs) carry
                pltpu.VMEM((1, hb), jnp.float32),    # running logsumexp carry
            ],
        ),
        compiler_params=pltpu.CompilerParams(
            dimension_semantics=("parallel", "parallel", "arbitrary")),
    )(x_in, h0_r, w_fused, b_fused)

    if T_pad != T or H_pad != H:
        out = out[:, :T, :H]
    return out


def mingru_reference(x, h0, wz_t, bz, wh_t, bh):
    """Pure-JAX reference mirroring the PyTorch module (log-space scan)."""
    B, T, D = x.shape
    H = wz_t.shape[1]

    def log_g(v):
        return jnp.where(v >= 0, jnp.log(jnp.maximum(v, 0.0) + 0.5),
                         -jnp.logaddexp(-v, 0.0))

    k = x @ wz_t + bz
    log_z = -jnp.logaddexp(-k, 0.0)           # -softplus(-k)
    log_coeffs = -jnp.logaddexp(k, 0.0)       # -softplus(k)
    log_tilde_h = log_g(x @ wh_t + bh)
    log_h0 = log_g(h0)
    log_values = jnp.concatenate([log_h0[:, None, :], log_z + log_tilde_h], axis=1)
    a_star = jnp.concatenate(
        [jnp.zeros((B, 1, H), jnp.float32), jnp.cumsum(log_coeffs, axis=1)], axis=1)
    log_h = a_star + lax.cumlogsumexp(log_values - a_star, axis=1)
    return jnp.exp(log_h)[:, 1:]


if __name__ == "__main__":
    # H=128 keeps the output lane-dense; T=64 with time_chunk=16 exercises the
    # cross-chunk carries (4 sequential chunks per (hidden-block, batch) pair).
    B, T, D, H = 2, 64, 16, 128

    key = jax.random.PRNGKey(0)
    kx, kh0, kwz, kbz, kwh, kbh = jax.random.split(key, 6)

    x = jax.random.normal(kx, (B, T, D), dtype=jnp.float32)
    h0 = jax.random.normal(kh0, (B, H), dtype=jnp.float32)

    # Deterministic parameter init mimicking nn.Linear (uniform +/- 1/sqrt(D)).
    bound = 1.0 / np.sqrt(D)
    wz_t = jax.random.uniform(kwz, (D, H), jnp.float32, -bound, bound)  # W_z^T
    bz = jax.random.uniform(kbz, (H,), jnp.float32, -bound, bound)
    wh_t = jax.random.uniform(kwh, (D, H), jnp.float32, -bound, bound)  # W_h^T
    bh = jax.random.uniform(kbh, (H,), jnp.float32, -bound, bound)

    h_kernel = mingru_forward(x, h0, wz_t, bz, wh_t, bh, time_chunk=16)
    h_kernel = jax.block_until_ready(h_kernel)

    h_ref = mingru_reference(x, h0, wz_t, bz, wh_t, bh)

    if np.allclose(np.asarray(h_kernel), np.asarray(h_ref), rtol=1e-4, atol=1e-4):
        print("KERNEL_OK")
    else:
        print("MISMATCH",
              float(np.max(np.abs(np.asarray(h_kernel) - np.asarray(h_ref)))))
</pallas_src>

<mosaic_0001>
module attributes {stable_mosaic.version = 11 : i64} {
  func.func @mingru_kernel(%arg0: i32, %arg1: i32, %arg2: i32, %arg3: memref<1x16x16xf32, #tpu.memory_space<vmem>>, %arg4: memref<1x1x128xf32, #tpu.memory_space<vmem>>, %arg5: memref<16x256xf32, #tpu.memory_space<vmem>>, %arg6: memref<1x256xf32, #tpu.memory_space<vmem>>, %arg7: memref<1x16x128xf32, #tpu.memory_space<vmem>>, %arg8: memref<16x16xf32, #tpu.memory_space<vmem>>, %arg9: memref<1x128xf32, #tpu.memory_space<vmem>>, %arg10: memref<1x128xf32, #tpu.memory_space<vmem>>) attributes {dimension_semantics = [#tpu.dimension_semantics<parallel>, #tpu.dimension_semantics<parallel>, #tpu.dimension_semantics<arbitrary>], iteration_bounds = array<i64: 1, 2, 4>, scalar_prefetch = 0 : i64, scratch_operands = 3 : i64, tpu.core_type = #tpu.core_type<tc>, window_params = [{transform_indices = @transform_0, window_bounds = array<i64: 1, 16, 16>}, {transform_indices = @transform_1, window_bounds = array<i64: 1, 1, 128>}, {transform_indices = @transform_2, window_bounds = array<i64: 16, 256>}, {transform_indices = @transform_3, window_bounds = array<i64: 1, 256>}, {transform_indices = @transform_4, window_bounds = array<i64: 1, 16, 128>}]} {
    %c0_i32 = arith.constant 0 : i32
    %0 = arith.cmpi eq, %arg2, %c0_i32 : i32
    %1 = arith.extui %0 : i1 to i32
    %c0_i32_0 = arith.constant 0 : i32
    %2 = arith.cmpi ne, %1, %c0_i32_0 : i32
    scf.if %2 {
      %74 = tpu.iota {dimensions = array<i32: 0>} : vector<16x16xi32>
      %75 = tpu.iota {dimensions = array<i32: 1>} : vector<16x16xi32>
      %76 = arith.cmpi sge, %74, %75 : vector<16x16xi32>
      %77 = arith.extui %76 : vector<16x16xi1> to vector<16x16xi32>
      %78 = arith.sitofp %77 : vector<16x16xi32> to vector<16x16xf32>
      %c0_30 = arith.constant 0 : index
      %c0_31 = arith.constant 0 : index
      %79 = vector.load %arg8[%c0_30, %c0_31] : memref<16x16xf32, #tpu.memory_space<vmem>>, vector<16x16xf32>
      tpu.vector_store %arg8[%c0_30, %c0_31], %78 {strides = array<i32>} : memref<16x16xf32, #tpu.memory_space<vmem>>, vector<16x16xf32>,
      %cst_32 = arith.constant 0.000000e+00 : f32
      %80 = vector.broadcast %cst_32 : f32 to vector<1x128xf32>
      %c0_33 = arith.constant 0 : index
      %c0_34 = arith.constant 0 : index
      %81 = vector.load %arg9[%c0_33, %c0_34] : memref<1x128xf32, #tpu.memory_space<vmem>>, vector<1x128xf32>
      tpu.vector_store %arg9[%c0_33, %c0_34], %80 {strides = array<i32>} : memref<1x128xf32, #tpu.memory_space<vmem>>, vector<1x128xf32>,
      %c0_35 = arith.constant 0 : index
      %c0_36 = arith.constant 0 : index
      %c0_37 = arith.constant 0 : index
      %82 = vector.load %arg4[%c0_35, %c0_36, %c0_37] : memref<1x1x128xf32, #tpu.memory_space<vmem>>, vector<1x1x128xf32>
      %83 = vector.shape_cast %82 : vector<1x1x128xf32> to vector<1x128xf32>
      %cst_38 = arith.constant 0.000000e+00 : f32
      %84 = vector.broadcast %cst_38 : f32 to vector<1x128xf32>
      %85 = arith.cmpf oge, %83, %84 : vector<1x128xf32>
      %cst_39 = arith.constant 5.000000e-01 : f32
      %86 = vector.broadcast %cst_39 : f32 to vector<1x128xf32>
      %87 = arith.addf %83, %86 : vector<1x128xf32>
      %88 = arith.negf %83 : vector<1x128xf32>
      %89 = math.exp %88 : vector<1x128xf32>
      %cst_40 = arith.constant 1.000000e+00 : f32
      %90 = vector.broadcast %cst_40 : f32 to vector<1x128xf32>
      %91 = arith.addf %90, %89 : vector<1x128xf32>
      %92 = arith.divf %90, %91 : vector<1x128xf32>
      %93 = arith.select %85, %87, %92 : vector<1x128xi1>, vector<1x128xf32>
      %cst_41 = arith.constant 1.17549435E-38 : f32
      %94 = vector.broadcast %cst_41 : f32 to vector<1x128xf32>
      %95 = arith.maximumf %93, %94 : vector<1x128xf32>
      %96 = math.log %95 : vector<1x128xf32>
      %c0_42 = arith.constant 0 : index
      %c0_43 = arith.constant 0 : index
      %97 = vector.load %arg10[%c0_42, %c0_43] : memref<1x128xf32, #tpu.memory_space<vmem>>, vector<1x128xf32>
      tpu.vector_store %arg10[%c0_42, %c0_43], %96 {strides = array<i32>} : memref<1x128xf32, #tpu.memory_space<vmem>>, vector<1x128xf32>,
    } else {
    }
    %c0 = arith.constant 0 : index
    %c0_1 = arith.constant 0 : index
    %c0_2 = arith.constant 0 : index
    %3 = vector.load %arg3[%c0, %c0_1, %c0_2] : memref<1x16x16xf32, #tpu.memory_space<vmem>>, vector<1x16x16xf32>
    %4 = vector.shape_cast %3 : vector<1x16x16xf32> to vector<16x16xf32>
    %c0_3 = arith.constant 0 : index
    %c0_4 = arith.constant 0 : index
    %5 = vector.load %arg5[%c0_3, %c0_4] : memref<16x256xf32, #tpu.memory_space<vmem>>, vector<16x256xf32>
    %cst = arith.constant dense<0.000000e+00> : vector<16x256xf32>
    %6 = tpu.matmul %4, %5, %cst {dimension_numbers = #tpu.dot_dimension_numbers<[1], [0], [0], [1], [0, 0, 1, 1], [], []>} : vector<16x16xf32>, vector<16x256xf32>, vector<16x256xf32> -> vector<16x256xf32>
    %c0_5 = arith.constant 0 : index
    %c0_6 = arith.constant 0 : index
    %7 = vector.load %arg6[%c0_5, %c0_6] : memref<1x256xf32, #tpu.memory_space<vmem>>, vector<1x256xf32>
    %8 = vector.broadcast %7 : vector<1x256xf32> to vector<16x256xf32>
    %9 = arith.addf %6, %8 : vector<16x256xf32>
    %10 = vector.extract_strided_slice %9 {offsets = [0, 0], sizes = [16, 128], strides = [1, 1]} : vector<16x256xf32> to vector<16x128xf32>
    %11 = vector.extract_strided_slice %9 {offsets = [0, 128], sizes = [16, 128], strides = [1, 1]} : vector<16x256xf32> to vector<16x128xf32>
    %cst_7 = arith.constant 0.000000e+00 : f32
    %12 = vector.broadcast %cst_7 : f32 to vector<16x128xf32>
    %13 = arith.maximumf %10, %12 : vector<16x128xf32>
    %14 = vector.broadcast %cst_7 : f32 to vector<16x128xf32>
    %15 = arith.subf %10, %14 : vector<16x128xf32>
    %16 = arith.cmpf one, %15, %15 : vector<16x128xf32>
    %17 = vector.broadcast %cst_7 : f32 to vector<16x128xf32>
    %18 = arith.addf %10, %17 : vector<16x128xf32>
    %19 = math.absf %15 : vector<16x128xf32>
    %cst_8 = arith.constant 0.000000e+00 : f32
    %20 = vector.broadcast %cst_8 : f32 to vector<16x128xf32>
    %21 = arith.subf %20, %19 : vector<16x128xf32>
    %22 = math.exp %21 : vector<16x128xf32>
    %23 = math.log1p %22 : vector<16x128xf32>
    %24 = arith.addf %13, %23 : vector<16x128xf32>
    %25 = arith.select %16, %18, %24 : vector<16x128xi1>, vector<16x128xf32>
    %cst_9 = arith.constant 0.000000e+00 : f32
    %26 = vector.broadcast %cst_9 : f32 to vector<16x128xf32>
    %27 = arith.subf %26, %25 : vector<16x128xf32>
    %28 = arith.subf %10, %25 : vector<16x128xf32>
    %cst_10 = arith.constant 0.000000e+00 : f32
    %29 = vector.broadcast %cst_10 : f32 to vector<16x128xf32>
    %30 = arith.cmpf oge, %11, %29 : vector<16x128xf32>
    %cst_11 = arith.constant 5.000000e-01 : f32
    %31 = vector.broadcast %cst_11 : f32 to vector<16x128xf32>
    %32 = arith.addf %11, %31 : vector<16x128xf32>
    %33 = arith.negf %11 : vector<16x128xf32>
    %34 = math.exp %33 : vector<16x128xf32>
    %cst_12 = arith.constant 1.000000e+00 : f32
    %35 = vector.broadcast %cst_12 : f32 to vector<16x128xf32>
    %36 = arith.addf %35, %34 : vector<16x128xf32>
    %37 = arith.divf %35, %36 : vector<16x128xf32>
    %38 = arith.select %30, %32, %37 : vector<16x128xi1>, vector<16x128xf32>
    %cst_13 = arith.constant 1.17549435E-38 : f32
    %39 = vector.broadcast %cst_13 : f32 to vector<16x128xf32>
    %40 = arith.maximumf %38, %39 : vector<16x128xf32>
    %41 = math.log %40 : vector<16x128xf32>
    %42 = arith.addf %28, %41 : vector<16x128xf32>
    %c0_14 = arith.constant 0 : index
    %c0_15 = arith.constant 0 : index
    %43 = vector.load %arg8[%c0_14, %c0_15] : memref<16x16xf32, #tpu.memory_space<vmem>>, vector<16x16xf32>
    %c0_16 = arith.constant 0 : index
    %c0_17 = arith.constant 0 : index
    %44 = vector.load %arg9[%c0_16, %c0_17] : memref<1x128xf32, #tpu.memory_space<vmem>>, vector<1x128xf32>
    %cst_18 = arith.constant dense<0.000000e+00> : vector<16x128xf32>
    %45 = tpu.matmul %43, %27, %cst_18 {dimension_numbers = #tpu.dot_dimension_numbers<[1], [0], [0], [1], [0, 0, 1, 1], [], []>} : vector<16x16xf32>, vector<16x128xf32>, vector<16x128xf32> -> vector<16x128xf32>
    %46 = vector.broadcast %44 : vector<1x128xf32> to vector<16x128xf32>
    %47 = arith.addf %46, %45 : vector<16x128xf32>
    %48 = arith.subf %42, %47 : vector<16x128xf32>
    %c0_19 = arith.constant 0 : index
    %c0_20 = arith.constant 0 : index
    %49 = vector.load %arg10[%c0_19, %c0_20] : memref<1x128xf32, #tpu.memory_space<vmem>>, vector<1x128xf32>
    %cst_21 = arith.constant dense<0xFF800000> : vector<128xf32>
    %50 = vector.multi_reduction <maximumf>, %48, %cst_21 [0] : vector<16x128xf32> to vector<128xf32>
    %51 = vector.shape_cast %50 : vector<128xf32> to vector<1x128xf32>
    %52 = arith.maximumf %49, %51 : vector<1x128xf32>
    %53 = vector.broadcast %52 : vector<1x128xf32> to vector<16x128xf32>
    %54 = arith.subf %48, %53 : vector<16x128xf32>
    %55 = math.exp %54 : vector<16x128xf32>
    %cst_22 = arith.constant dense<0.000000e+00> : vector<16x128xf32>
    %56 = tpu.matmul %43, %55, %cst_22 {dimension_numbers = #tpu.dot_dimension_numbers<[1], [0], [0], [1], [0, 0, 1, 1], [], []>} : vector<16x16xf32>, vector<16x128xf32>, vector<16x128xf32> -> vector<16x128xf32>
    %57 = arith.subf %49, %52 : vector<1x128xf32>
    %58 = math.exp %57 : vector<1x128xf32>
    %59 = vector.broadcast %58 : vector<1x128xf32> to vector<16x128xf32>
    %60 = arith.addf %59, %56 : vector<16x128xf32>
    %61 = vector.broadcast %52 : vector<1x128xf32> to vector<16x128xf32>
    %62 = arith.addf %47, %61 : vector<16x128xf32>
    %63 = math.exp %62 : vector<16x128xf32>
    %64 = arith.mulf %63, %60 : vector<16x128xf32>
    %c0_23 = arith.constant 0 : index
    %c0_24 = arith.constant 0 : index
    %c0_25 = arith.constant 0 : index
    %65 = vector.load %arg7[%c0_23, %c0_24, %c0_25] : memref<1x16x128xf32, #tpu.memory_space<vmem>>, vector<1x16x128xf32>
    %66 = vector.shape_cast %65 : vector<1x16x128xf32> to vector<16x128xf32>
    %67 = vector.shape_cast %64 : vector<16x128xf32> to vector<1x16x128xf32>
    tpu.vector_store %arg7[%c0_23, %c0_24, %c0_25], %67 {strides = array<i32>} : memref<1x16x128xf32, #tpu.memory_space<vmem>>, vector<1x16x128xf32>,
    %68 = vector.extract_strided_slice %47 {offsets = [15, 0], sizes = [1, 128], strides = [1, 1]} : vector<16x128xf32> to vector<1x128xf32>
    %c0_26 = arith.constant 0 : index
    %c0_27 = arith.constant 0 : index
    %69 = vector.load %arg9[%c0_26, %c0_27] : memref<1x128xf32, #tpu.memory_space<vmem>>, vector<1x128xf32>
    tpu.vector_store %arg9[%c0_26, %c0_27], %68 {strides = array<i32>} : memref<1x128xf32, #tpu.memory_space<vmem>>, vector<1x128xf32>,
    %70 = vector.extract_strided_slice %60 {offsets = [15, 0], sizes = [1, 128], strides = [1, 1]} : vector<16x128xf32> to vector<1x128xf32>
    %71 = math.log %70 : vector<1x128xf32>
    %72 = arith.addf %52, %71 : vector<1x128xf32>
    %c0_28 = arith.constant 0 : index
    %c0_29 = arith.constant 0 : index
    %73 = vector.load %arg10[%c0_28, %c0_29] : memref<1x128xf32, #tpu.memory_space<vmem>>, vector<1x128xf32>
    tpu.vector_store %arg10[%c0_28, %c0_29], %72 {strides = array<i32>} : memref<1x128xf32, #tpu.memory_space<vmem>>, vector<1x128xf32>,
    return
  }
  func.func @transform_0(%arg0: i32, %arg1: i32, %arg2: i32) -> (i32, i32, i32) {
    %c0_i32 = arith.constant 0 : i32
    %c0_i32_0 = arith.constant 0 : i32
    return %arg1, %arg2, %c0_i32 : i32, i32, i32
  }
  func.func @transform_1(%arg0: i32, %arg1: i32, %arg2: i32) -> (i32, i32, i32) {
    %c0_i32 = arith.constant 0 : i32
    %c0_i32_0 = arith.constant 0 : i32
    return %arg1, %c0_i32, %arg0 : i32, i32, i32
  }
  func.func @transform_2(%arg0: i32, %arg1: i32, %arg2: i32) -> (i32, i32) {
    %c0_i32 = arith.constant 0 : i32
    %c0_i32_0 = arith.constant 0 : i32
    return %c0_i32, %arg0 : i32, i32
  }
  func.func @transform_3(%arg0: i32, %arg1: i32, %arg2: i32) -> (i32, i32) {
    %c0_i32 = arith.constant 0 : i32
    %c0_i32_0 = arith.constant 0 : i32
    return %c0_i32, %arg0 : i32, i32
  }
  func.func @transform_4(%arg0: i32, %arg1: i32, %arg2: i32) -> (i32, i32, i32) {
    %c0_i32 = arith.constant 0 : i32
    return %arg1, %arg2, %arg0 : i32, i32, i32
  }
}

</mosaic_0001>

<bundles_post_ra>
// kernel: tpu_custom_call.1
= control target key start
LH: loop header
LB: loop body
LE: loop exit
PB: predicated region body
PF: predicated region fallthrough
CT: control target
= control target key end

     0   :  { %9 = vsyncpa [#allocation6], 0  ;;  %s1401_s0 = inlined_call_operand.vmem [shape: f32[2,64,16], index: 0, kind: input, shape index: {}]   ;;  %s1402_s1 = inlined_call_operand.vmem [shape: f32[2,1,128], index: 1, kind: input, shape index: {}]   ;;  %s1403_s2 = inlined_call_operand.vmem [shape: f32[16,256], index: 2, kind: input, shape index: {}]   ;;  %s1404_s3 = inlined_call_operand.vmem [shape: f32[1,256], index: 3, kind: input, shape index: {}]   ;;  %s1405_s4 = inlined_call_operand.hbm [shape: f32[2,64,128], index: 4, kind: output, shape index: {}]  }
   0x1   :  { %11 = vsyncpa [#allocation6 + $0x1], 0  ;;  %s1185_s15 = smov 0   ;;  %s1187_s16 = smov 0  }
   0x2   :  { %s1189_s17 = smov 0   ;;  %s1191_s18 = smov 0  }
   0x3   :  { %s1193_s19 = smov 0   ;;  %s1195_s20 = smov 0  }
   0x4   :  { %s1197_s21 = smov 0   ;;  %s1199_s22 = smov 0  }
   0x5 LB: > { %s880_s23 = sadd.s32 4294967295, %s1152_s22   ;;  %s881_s24 = sadd.s32 4294967294, %s1152_s22   ;;  %s1152_s22 = sphi %s1199_s22, %s17_s22   ;;  %s1148_s21 = sphi %s1197_s21, %s1420_s21   ;;  %s1144_s20 = sphi %s1195_s20, %s1419_s20   ;;  %s1140_s19 = sphi %s1193_s19, %s1418_s19   ;;  %s1136_s18 = sphi %s1191_s18, %s1417_s18   ;;  %s1132_s17 = sphi %s1189_s17, %s1416_s17   ;;  %s1128_s16 = sphi %s1187_s16, %s1415_s16   ;;  %s1124_s15 = sphi %s1185_s15, %s1414_s15  }
   0x6   : > { %s29_s25 = sadd.s32 1, %s1144_s20  ;;  %s32_s26 = sadd.s32 1, %s1148_s21 }
   0x7   : > { %p30_p0 = scmp.ge.s32.totalorder %s29_s25, 4  ;;  %p165_p1 = scmp.ne.s32.totalorder %s1132_s17, %s1128_s16 }
   0x8   : > { %p166_p2 = scmp.eq.s32.totalorder %s880_s23, 7  ;;  %p171_p5 = scmp.ne.s32.totalorder %s1128_s16, %s1124_s15 }
   0x9   : > { %s1422_s25 = smov (%p30_p0, %s29_s25), 0  ;;  %s1424_s26 = smov (!%p30_p0, %s32_s26), %s1148_s21 }
   0xa   : > { %1408 = sst [smem:[#allocation8_spill]] %s1422_s25  ;;  %s149_s27 = ssub.s32 %s1144_s20, %s1422_s25 }
   0xb   : > { %p1236_p3 = por %p166_p2, %p165_p1  ;;  %p34_p4 = scmp.ge.s32.totalorder %s1424_s26, 2 }
   0xc   : > { %p172_p6 = scmp.eq.s32.totalorder %s881_s24, 7  ;;  %p886_p7 = scmp.ge.s32.totalorder %s1152_s22, 1 }
   0xd   : > { %s1426_s26 = smov (%p34_p4, %s1424_s26), 0  ;;  %p229_p9 = scmp.lt.s32.totalorder %s1152_s22, 9 }
   0xe   : > { %1410 = sst [smem:[#allocation9_spill]] %s1426_s26  ;;  %p1245_p8 = por %p172_p6, %p171_p5 }
   0xf   : > { %s148_s30 = ssub.s32 %s1148_s21, %s1426_s26  ;;  %s155_s5 = sadd.s32 1, %s1132_s17 }
  0x10   : > { %s150_s6 = sor.u32 %s149_s27, %s148_s30  ;;  %p230_p10 = pnand %p886_p7, %p229_p9 }
  0x11   : > { %p153_p11 = scmp.eq.s32.totalorder %s150_s6, 0  ;;  %s271_s8 = sand.u32 (!%p230_p10), 1, %s1128_s16  }
  0x12   : > { %233 = sbr.rel (%p230_p10) target bundleno = 844 (0x34c), region = 36  ;;  %s1258_s9 = sshll.u32 (!%p230_p10), %s1136_s18, 1 }
  0x13   : > { %s1254_s7 = scalar_select %p153_p11, %s1132_s17, %s155_s5  }
  0x14   : > { %s887_s10 = sshll.u32 (!%p230_p10), %s271_s8, 4  ;;  %p275_p12 = scmp.lt.s32.totalorder (!%p230_p10), %s1140_s19, 1 }
  0x15   : > { %p277_p13 = scmp.lt.s32.totalorder (!%p230_p10), %s1258_s9, 7  ;;  %s1274_s25 = scalar_lea.vmem (!%p230_p10), [#allocation5], %s887_s10 }
  0x16   : > { %p891_p0 = scmp.ne.s32.totalorder (!%p230_p10), %s1136_s18, 0 }
  0x19   : > { %s276_s11 = scalar_select %p275_p12, %s1140_s19, 1 }
  0x1a   : > { %s278_s12 = scalar_select %p277_p13, %s1258_s9, 7 }
  0x1b   : > { %s889_s13 = sshll.u32 %s276_s11, 3  ;;  %s289_s24 = scalar_lea.vmem %s1402_s1, %s276_s11  ;;  %v306_v0 = vlaneseq (!%p891_p0)  ;;  %v1154_v2 = vmov (!%p891_p0), 0.0   ;;  %vm317_vm0 = vcmask (!%p891_p0), 130048  }
  0x1c   : > { %s280_s27 = sadd.s32 %s889_s13, %s278_s12  ;;  %305 = sbr.rel (%p891_p0) target bundleno = 72 (0x48), region = 40  ;;  %v321_v1 = vld [vmem:[%s289_s24] sm:$0x1] (!%p891_p0)  ;;  %320 = vst [vmem:[#allocation3] sm:$0x1] (!%p891_p0), %v1154_v2 }
  0x1d   : > { %s890_s30 = sshll.u32 %s280_s27, 3  ;;  %v894_v3 = vmul.f32 (!%p891_p0), -1.442695, %v321_v1  ;;  %v307_v4 = vshrl.u32 (!%p891_p0), %v306_v0, 7  ;;  %v310_v5 = vand.u32 (!%p891_p0), 127, %v306_v0  ;;  %v323_v11 = vadd.f32 (!%p891_p0), 0.5, %v321_v1 }
  0x1e   : > { %s1272_s26 = scalar_lea.vmem %s1401_s0, %s890_s30  ;;  %vm322_vm3 = vcmp.ge.f32.partialorder (!%p891_p0), %v321_v1, 0.0 }
  0x1f   : > { %1020 = vpow2.f32 (!%p891_p0), %v894_v3  ;;  %vm311_vm1 = vcmp.ge.s32.totalorder (!%p891_p0), %v307_v4, %v310_v5  ;;  %v308_v6 = vadd.s32 (!%p891_p0), 8, %v307_v4 }
  0x20   : > { %v892_v7 = vsel (!%p891_p0), %vm311_vm1, 1.0, %v1154_v2 }
  0x21   : > { %318 = vst.msk [vmem:[#allocation2] sm:$0xff] (!%p891_p0), %vm317_vm0, %v892_v7  ;;  %vm312_vm2 = vcmp.ge.s32.totalorder (!%p891_p0), %v308_v6, %v310_v5 }
  0x22   : > { %v893_v8 = vsel (!%p891_p0), %vm312_vm2, 1.0, %v1154_v2 }
  0x23   : > { %319 = vst.msk [vmem:[#allocation2 + $0x8] sm:$0xff] %vm317_vm0, %v893_v8 }
  0x29   : > { %v1021_v9 = vpop.eup %1020 }
  0x2a   : > { %v327_v10 = vadd.f32 1.0, %v1021_v9 }
  0x2c   : > { %1022 = vrcp.f32 %v327_v10 }
  0x36   : > { %v1023_v12 = vpop.eup %1022 }
  0x37   : > { %v330_v13 = vsel %vm322_vm3, %v323_v11, %v1023_v12 }
  0x38   : > { %v331_v14 = vmax.f32 %v330_v13, 1.1754944e-38 }
  0x3a   : > { %1024 = vlog2.f32 %v331_v14 }
  0x44   : > { %v1025_v15 = vpop.eup %1024 }
  0x45   : > { %v333_v16 = vmul.f32 0.6931472, %v1025_v15 }
  0x47   : > { %334 = vst [vmem:[#allocation4] sm:$0x1] %v333_v16 }
  0x48 PF: > { %v338_v17 = vld [vmem:[%s1403_s2 + $0x8] sm:$0xff]  ;;  %v340_v18 = vld [vmem:[%s1403_s2 + $0x18] sm:$0xff]  ;;  %v337_v19 = vld [vmem:[%s1403_s2] sm:$0xff]  ;;  %v1155_v22 = vmov 0.0   ;;  %vm353_vm4 = vcmask 130048   ;;  %v343_v27 = vlaneseq  ;;  %s755_s18 = sshll.u32 %s1274_s25, 4  ;;  %s1341_s18 = int_to_ptr.vmem [resolvable:$true] %s755_s18 }
  0x49   : > { %v932_v20 = vpack.c.bf16 %v340_v18, %v338_v17  ;;  %v339_v21 = vld [vmem:[%s1403_s2 + $0x10] sm:$0xff]  ;;  %424 = vmatprep.mubr.f32.mxu0 %v1155_v22  ;;  %v335_v24 = vld [vmem:[%s1272_s26] sm:$0xff]  ;;  %v336_v25 = vld [vmem:[%s1272_s26 + $0x8] sm:$0xff]  ;;  %s906_s26 = sshll.u32 %s1140_s19, 3  ;;  %s1058_s12 = scalar_lea.vmem %s1341_s18, 256 }
  0x4a   : > { %v934_v23 = vpack.c.bf16 %v339_v21, %v337_v19  ;;  %v1297_v28 = vshrl.u32 %v343_v27, 7  ;;  %v341_v30 = vld [vmem:[%s1404_s3] sm:$0x3]  ;;  %s752_s5 = sadd.s32 %s906_s26, %s1258_s9  ;;  %s1347_s9 = scalar_lea.sflag [#allocation6], %s271_s8 }
  0x4b   : > { %933 = vmatprep.subr.bf16.mxu0 %v932_v20  ;;  %s907_s6 = sshll.u32 %s752_s5, 7  ;;  %p1059_p1 = scmp.ne.s32.totalorder %s1341_s18, %s1058_s12 }
  0x4c   : > { %935 = vmatpush1.bf16.msra.mxu0 %v934_v23  ;;  %v1300_v29 = vsub.s32 0, %v1297_v28  ;;  %v349_v31 = vsub.s32 1, %v1297_v28  ;;  %s1339_s11 = scalar_lea.hbm %s1405_s4, %s907_s6  ;;  %s1157_s13 = smov [#allocation5]  }
  0x4d   : > { %v1293_v26 = vld [vmem:[#allocation2] sm:$0xff]  ;;  %p1060_p2 = pnand %p1059_p1, %p1236_p3  ;;  %s1062_s14 = sshll.u32 %s1157_s13, 4  ;;  %s1063_s14 = int_to_ptr.vmem [resolvable:$false] %s1062_s14 }
  0x4e   : > { %922 = vmatprep.mubr.msk.f32.mxu1 %vm353_vm4, %v1293_v26  ;;  %v346_v32 = vrot.slane %v341_v30, %v1300_v29  ;;  %v350_v33 = vrot.slane %v341_v30, %v349_v31  ;;  %s1064_s23 = scalar_lea.vmem %s1063_s14, 512  ;;  %p1065_p5 = scmp.lt.s32.totalorder %s1341_s18, %s1063_s14 }
  0x4f   : > { %895 = vmatmul.mubr.msk.f32.vlgmr.msra.gmra.mrb[0].mxu0 %vm353_vm4, %v335_v24  ;;  %p1061_p4 = pneg %p1060_p2  ;;  %p1066_p6 = scmp.lt.s32.totalorder %s1064_s23, %s1058_s12 }
  0x50   : > { %430 = vmatprep.mubr.f32.mxu0 %v1155_v22 }
  0x51   : > { %p1067_p7 = por %p1066_p6, %p1065_p5 }
  0x53   : > { %896 = vmatmul.mubr.msk.f32.gmra.mrb[2].mxu0 %vm353_vm4, %v336_v25  ;;  %p1068_p9 = pnand %p1067_p7, %p1061_p4 }
 0x122   : > { %v426_v34 = vpop.f32.mrb[0].mxu0 }
 0x123   : > { %v1307_v35 = vadd.f32 %v426_v34, %v346_v32  ;;  %v428_v36 = vpop.f32.mrb[1].mxu0  ;;  %v504_v34 = vld [vmem:[#allocation2 + $0x8] sm:$0xff] }
 0x124   : > { %v429_v37 = vadd.f32 %v428_v36, %v350_v33 }
 0x125   : > { %v443_v38 = vand.u32 2147483647, %v1307_v35  ;;  %v437_v9 = vmax.f32 %v1307_v35, 0.0  ;;  %vm439_vm8 = vcmp.ne.f32.partialorder %v1307_v35, %v1307_v35 }
 0x126   : > { %v897_v39 = vmul.f32 -1.442695, %v429_v37  ;;  %v432_v40 = vpop.f32.mrb[2].mxu0  ;;  %v479_v59 = vadd.f32 0.5, %v429_v37  ;;  %vm477_vm5 = vcmp.ge.f32.partialorder %v429_v37, 0.0 }
 0x127   : > { %v445_v41 = vsub.f32 0.0, %v443_v38  ;;  %v1310_v42 = vadd.f32 %v432_v40, %v346_v32  ;;  %v434_v43 = vpop.f32.mrb[3].mxu0  ;;  %v901_v37 = vld [vmem:[#allocation3] ss:$0 sm:$0xff] }
 0x128   : > { %1026 = vpow2.f32 %v897_v39  ;;  %v435_v44 = vadd.f32 %v434_v43, %v350_v33 }
 0x129   : > { %v447_v45 = vmul.f32 1.442695, %v445_v41  ;;  %v444_v46 = vand.u32 2147483647, %v1310_v42  ;;  %v438_v17 = vmax.f32 %v1310_v42, 0.0  ;;  %vm440_vm10 = vcmp.ne.f32.partialorder %v1310_v42, %v1310_v42 }
 0x12a   : > { %v898_v47 = vmul.f32 -1.442695, %v435_v44  ;;  %vm478_vm6 = vcmp.ge.f32.partialorder %v435_v44, 0.0  ;;  %v480_v3 = vadd.f32 0.5, %v435_v44 }
 0x12b   : > { %1028 = vpow2.f32 %v447_v45  ;;  %v446_v48 = vsub.f32 0.0, %v444_v46 }
 0x12c   : > { %1030 = vpow2.f32 %v898_v47 }
 0x12d   : > { %v449_v49 = vmul.f32 1.442695, %v446_v48 }
 0x12f   : > { %1032 = vpow2.f32 %v449_v49 }
 0x132   : > { %v1027_v50 = vpop.eup %1026 }
 0x133   : > { %v487_v51 = vadd.f32 1.0, %v1027_v50  ;;  %v597_v50 = vld [vmem:[#allocation4] sm:$0x1] }
 0x135   : > { %v1029_v52 = vpop.eup %1028  ;;  %1034 = vrcp.f32 %v487_v51 }
 0x136   : > { %v1031_v53 = vpop.eup %1030  ;;  %v451_v54 = vadd.f32 1.0, %v1029_v52  ;;  %v454_v58 = vmul.f32 -0.5, %v1029_v52  ;;  %v457_v0 = vand.u32 2147483647, %v1029_v52 }
 0x137   : > { %v488_v55 = vadd.f32 1.0, %v1031_v53 }
 0x138   : > { %1036 = vlog2.f32 %v451_v54  ;;  %v455_v61 = vadd.f32 1.0, %v454_v58  ;;  %vm458_vm7 = vcmp.lt.f32.partialorder %v457_v0, 0.0004427343 }
 0x139   : > { %v1033_v56 = vpop.eup %1032  ;;  %1038 = vrcp.f32 %v488_v55 }
 0x13a   : > { %v460_v57 = vadd.f32 1.0, %v1033_v56  ;;  %v463_v62 = vmul.f32 -0.5, %v1033_v56  ;;  %v456_v6 = vmul.f32 %v1029_v52, %v455_v61  ;;  %v466_v10 = vand.u32 2147483647, %v1033_v56 }
 0x13c   : > { %1040 = vlog2.f32 %v460_v57  ;;  %v464_v7 = vadd.f32 1.0, %v463_v62  ;;  %vm467_vm9 = vcmp.lt.f32.partialorder %v466_v10, 0.0004427343 }
 0x13e   : > { %v465_v16 = vmul.f32 %v1033_v56, %v464_v7 }
 0x13f   : > { %v1035_v60 = vpop.eup %1034 }
 0x140   : > { %v493_v63 = vsel %vm477_vm5, %v479_v59, %v1035_v60 }
 0x141   : > { %v495_v1 = vmax.f32 %v493_v63, 1.1754944e-38 }
 0x142   : > { %v1037_v2 = vpop.eup %1036 }
 0x143   : > { %v1039_v4 = vpop.eup %1038  ;;  %1042 = vlog2.f32 %v495_v1  ;;  %v453_v5 = vmul.f32 0.6931472, %v1037_v2 }
 0x144   : > { %v494_v8 = vsel %vm478_vm6, %v480_v3, %v1039_v4 }
 0x145   : > { %v496_v11 = vmax.f32 %v494_v8, 1.1754944e-38  ;;  %v459_v12 = vsel %vm458_vm7, %v456_v6, %v453_v5 }
 0x146   : > { %v1041_v13 = vpop.eup %1040  ;;  %v469_v14 = vadd.f32 %v459_v12, %v437_v9 }
 0x147   : > { %1044 = vlog2.f32 %v496_v11  ;;  %v462_v15 = vmul.f32 0.6931472, %v1041_v13  ;;  %v1156_v11 = vmov 1966171168  }
 0x148   : > { %v471_v18 = vsel %vm439_vm8, %v1307_v35, %v469_v14  ;;  %v720_v12 = vunpack.c.l.s4 %v1156_v11 }
 0x149   : > { %v468_v19 = vsel %vm467_vm9, %v465_v16, %v462_v15  ;;  %v475_v20 = vsub.f32 %v1307_v35, %v471_v18  ;;  %v473_v24 = vsub.f32 0.0, %v471_v18 }
 0x14a   : > { %v470_v21 = vadd.f32 %v468_v19, %v438_v17 }
 0x14c   : > { %v472_v22 = vsel %vm440_vm10, %v1310_v42, %v470_v21 }
 0x14d   : > { %v1043_v23 = vpop.eup %1042  ;;  %v474_v25 = vsub.f32 0.0, %v472_v22  ;;  %v476_v27 = vsub.f32 %v1310_v42, %v472_v22 }
 0x14e   : > { %v498_v30 = vmul.f32 0.6931472, %v1043_v23 }
 0x14f   : > { %v936_v31 = vpack.c.bf16 %v474_v25, %v473_v24 }
 0x150   : > { %v501_v32 = vadd.f32 %v498_v30, %v475_v20 }
 0x151   : > { %v1045_v33 = vpop.eup %1044  ;;  %937 = vmatprep.subr.bf16.mxu1 %v936_v31 }
 0x152   : > { %939 = vmatpush3.bf16.msra.mxu1 %v936_v31  ;;  %v500_v36 = vmul.f32 0.6931472, %v1045_v33 }
 0x154   : > { %v502_v35 = vadd.f32 %v500_v36, %v476_v27 }
 0x155   : > { %923 = vmatmul.mubr.msk.f32.vlgmr.msra.gmra.mrb[0].mxu1 %vm353_vm4, %v504_v34 }
 0x156   : > { %929 = vmatprep.mubr.msk.f32.mxu1 %vm353_vm4, %v1293_v26 }
 0x228   : > { %v924_v38 = vpop.f32.mrb[0].mxu1 }
 0x229   : > { %v594_v39 = vadd.f32 %v924_v38, %v901_v37  ;;  %v578_v40 = vpop.f32.mrb[1].mxu1 }
 0x22a   : > { %v593_v41 = vadd.f32 %v901_v37, %v578_v40 }
 0x22b   : > { %v596_v42 = vsub.f32 %v502_v35, %v594_v39  ;;  %714 = vst [vmem:[#allocation3 - $0x7] sm:$0x80] %v594_v39 }
 0x22c   : > { %v595_v43 = vsub.f32 %v501_v32, %v593_v41 }
 0x22e   : > { %v598_v44 = vmax.f32 %v595_v43, %v596_v42 }
 0x230   : > { %v599_v45 = vrot.slane %v598_v44, 4 }
 0x232   : > { %v600_v46 = vmax.f32 %v598_v44, %v599_v45 }
 0x234   : > { %v601_v47 = vrot.slane %v600_v46, 2 }
 0x236   : > { %v602_v48 = vmax.f32 %v600_v46, %v601_v47 }
 0x238   : > { %v603_v49 = vrot.slane %v602_v48, 1 }
 0x23a   : > { %v604_v51 = vmax.f32 %v602_v48, %v603_v49 }
 0x23c   : > { %v1326_v52 = vmax.f32 %v597_v50, %v604_v51 }
 0x23e   : > { %v610_v26 = vrot.slane %v1326_v52, %v1300_v29  ;;  %v693_v62 = vsub.f32 %v597_v50, %v1326_v52 }
 0x240   : > { %v612_v53 = vsub.f32 %v595_v43, %v610_v26  ;;  %v704_v54 = vadd.f32 %v610_v26, %v593_v41  ;;  %v613_v55 = vsub.f32 %v596_v42, %v610_v26  ;;  %v705_v56 = vadd.f32 %v610_v26, %v594_v39 }
 0x241   : > { %v694_v63 = vmul.f32 1.442695, %v693_v62 }
 0x242   : > { %v614_v57 = vmul.f32 1.442695, %v612_v53  ;;  %v616_v58 = vmul.f32 1.442695, %v613_v55  ;;  %v708_v0 = vmul.f32 1.442695, %v705_v56 }
 0x243   : > { %v706_v1 = vmul.f32 1.442695, %v704_v54 }
 0x244   : > { %1046 = vpow2.f32 %v614_v57 }
 0x245   : > { %1048 = vpow2.f32 %v616_v58 }
 0x246   : > { %1050 = vpow2.f32 %v694_v63 }
 0x247   : > { %1052 = vpow2.f32 %v708_v0 }
 0x248   : > { %1054 = vpow2.f32 %v706_v1 }
 0x24e   : > { %v1047_v59 = vpop.eup %1046 }
 0x24f   : > { %v1049_v60 = vpop.eup %1048 }
 0x250   : > { %v940_v61 = vpack.c.bf16 %v1049_v60, %v1047_v59  ;;  %v1051_v2 = vpop.eup %1050 }
 0x251   : > { %v700_v3 = vrot.slane %v1051_v2, %v1300_v29  ;;  %v1053_v7 = vpop.eup %1052 }
 0x252   : > { %941 = vmatprep.subr.bf16.mxu1 %v940_v61  ;;  %v1055_v9 = vpop.eup %1054 }
 0x253   : > { %943 = vmatpush3.bf16.msra.mxu1 %v940_v61 }
 0x256   : > { %930 = vmatmul.mubr.msk.f32.vlgmr.msra.gmra.mrb[2].mxu1 %vm353_vm4, %v504_v34 }
 0x329   : > { %v931_v4 = vpop.f32.mrb[2].mxu1 }
 0x32a   : > { %v703_v5 = vadd.f32 %v931_v4, %v700_v3  ;;  %v684_v6 = vpop.f32.mrb[3].mxu1 }
 0x32b   : > { %v702_v8 = vadd.f32 %v700_v3, %v684_v6 }
 0x32c   : > { %v711_v10 = vmul.f32 %v1053_v7, %v703_v5  ;;  %1056 = vlog2.f32 %v703_v5 }
 0x32d   : > { %v710_v29 = vmul.f32 %v1055_v9, %v702_v8 }
 0x32e   : > { %713 = vst [vmem:[%s1274_s25 + $0x8] sm:$0xff] %v711_v10 }
 0x32f   : > { %712 = vst [vmem:[%s1274_s25] sm:$0xff] %v710_v29 }
 0x330   : > { %1071 = shalt.err (!%p1068_p9)
}
 0x331   : > { %s1072_s25 = scalar_lea.hbm %s1339_s11, 256  ;;  %s1076_s27 = scalar_lea.hbm %s1405_s4, 2048 }
 0x332   : > { %p1073_p10 = scmp.ne.s32.totalorder %s1339_s11, %s1072_s25  ;;  %p1077_p13 = scmp.lt.u32.totalorder %s1339_s11, %s1405_s4 }
 0x333   : > { %p1078_p0 = scmp.lt.u32.totalorder %s1076_s27, %s1072_s25  ;;  %p1080_p2 = scmp.lt.u32.totalorder %s1072_s25, %s1339_s11 }
 0x334   : > { %p1074_p11 = pnand %p1073_p10, %p1236_p3 }
 0x335   : > { %p1079_p1 = por %p1078_p0, %p1077_p13 }
 0x336   : > { %p1075_p12 = pneg %p1074_p11 }
 0x337   : > { %p1081_p4 = por %p1080_p2, %p1079_p1 }
 0x339   : > { %p1082_p5 = pnand %p1081_p4, %p1075_p12 }
 0x33b   : > { %1085 = shalt.err (!%p1082_p5)
}
 0x33c   : > { %s1158_s5 = smov 128   ;;  %s1159_s6 = smov 8   ;;  %v721_v13 = vunpack.c.0.s8 %v720_v12  ;;  %v1057_v14 = vpop.eup %1056 }
 0x33d   : > { %944 = dma.vmem_to_hbm [thread:$0]  (%p1236_p3), %s1341_s18, 256, %s1339_s11, %s1347_s9, %s1158_s5, %s1158_s5, %s1159_s6   ;;  %v716_v15 = vmul.f32 0.6931472, %v1057_v14 }
 0x33e   : > { %v724_v16 = vsub.s32 %v721_v13, %v1297_v28 }
 0x33f   : > { %v718_v17 = vcombine.high %v716_v15, %v716_v15 }
 0x341   : > { %v725_v18 = vrot.slane %v718_v17, %v724_v16 }
 0x343   : > { %v726_v19 = vcombine.high %v725_v18, %v725_v18 }
 0x345   : > { %v733_v20 = vrot.slane %v726_v19, %v724_v16 }
 0x347   : > { %v734_v21 = vcombine.high %v733_v20, %v733_v20 }
 0x349   : > { %v736_v22 = vadd.f32 %v734_v21, %v1326_v52 }
 0x34b   : > { %737 = vst [vmem:[#allocation4] sm:$0x1] %v736_v22 }
 0x34c PF: > { %p950_p6 = scmp.ge.s32.totalorder %s1152_s22, 2  ;;  %s770_s28 = sand.u32 1, %s1124_s15  }
 0x34d   : > { %s771_s18 = scalar_lea.sflag [#allocation6], %s770_s28 }
 0x34e   : > { %p947_p3 = pnand %p950_p6, %p1245_p8 }
 0x350   : > { %1119 = dma.done.wait (!%p947_p3), %s771_s18, 256  }
 0x351   : > { %1121 = vsyncadd (!%p947_p3), %s771_s18, 4294967040  ;;  %s17_s22 = sadd.s32 1, %s1152_s22   ;;  %s1412_s10 = sld [smem:[#allocation8_spill]] }
 0x352   : > { %p14_p7 = scmp.ge.s32.totalorder %s17_s22, 10   ;;  %s1413_s11 = sld [smem:[#allocation9_spill]] }
 0x353   : > { %s1414_s15 = smov %s1128_s16  ;;  %s1415_s16 = smov %s1132_s17 }
 0x354   : > { %s1416_s17 = smov %s1254_s7  ;;  %s1417_s18 = smov %s1144_s20 }
 0x355   : > { %s1418_s19 = smov %s1148_s21  ;;  %16 = sbr.rel (!%p14_p7) target bundleno = 5 (0x5), region = 84 }
 0x357   : > { %s1419_s20 = smov %s1412_s10 }
 0x358   : > { %s1420_s21 = smov %s1413_s11 }
 0x35c   :  { %776 = vsyncpa [#allocation6], 1 }
 0x35d   :  { %778 = vsyncpa [#allocation6 + $0x1], 1 }

</bundles_post_ra>
